<compile_context>
chip_gen: v7x
topology: tpu7x:2x2x1
jax: 0.10.0
libtpu: 0.0.40
codegen_flags: <defaults>
</compile_context>

<pallas_src>
import functools

import numpy as np
import jax
import jax.numpy as jnp
from jax import lax
from jax.experimental import pallas as pl
from jax.experimental.pallas import tpu as pltpu


def _round_up(x, m):
    return ((x + m - 1) // m) * m


# -----------------------------------------------------------------------------
# Fused Pallas kernel
# -----------------------------------------------------------------------------
def _fused_kernel(rel_vec_ref, det_ref, rel_prob_ref, rel_arr_ref,
                  hoi_ref, ids_ref, *, num_obj):
    """Fused: get_matching_scores + max/argmax + gather-at-argmax + hoi_scores.

    rel_vec_ref : (TR, 128) f32   lanes 0..3 = (sx, sy, ox, oy) in pixels
    det_ref     : (8, Npad) f32   rows: 0=cx 1=cy 2=score 3=score*subject_mask 4=label
    rel_prob_ref: (TR, Kpad) f32  sigmoid(rel logits), zero-padded
    rel_arr_ref : (Cpad, Kpad) f32  rel_array.T, zero-padded (exact {0,1} entries)
    hoi_ref     : (TR, Kpad) f32  valid_mask * rel_prob * s_score[argmax] * o_score[argmax]
    ids_ref     : (TR, 128) i32   lane0 = subject argmax col, lane1 = object argmax col
    """
    rel = rel_vec_ref[...]                      # (TR, 128)
    det = det_ref[...]                          # (8, Npad)
    cx = det[0:1, :]                            # (1, Npad)
    cy = det[1:2, :]
    sc = det[2:3, :]                            # raw scores
    sm = det[3:4, :]                            # scores * subject_mask (pre-folded)
    lb = det[4:5, :]                            # labels (f32)

    # |rel_center - det_center| distances, (TR,1) broadcast against (1,Npad)
    dsx = jnp.abs(rel[:, 0:1] - cx)
    dsy = jnp.abs(rel[:, 1:2] - cy)
    dox = jnp.abs(rel[:, 2:3] - cx)
    doy = jnp.abs(rel[:, 3:4] - cy)

    # folded: 1/(a+1) * 1/(b+1) == 1/((a+1)*(b+1))  -> single exact divide each
    dist_s = pl.reciprocal((dsx + 1.0) * (dsy + 1.0), approx=False) * sm
    dist_o = pl.reciprocal((dox + 1.0) * (doy + 1.0), approx=False) * sc

    TR, Npad = dist_s.shape
    col = lax.broadcasted_iota(jnp.int32, (TR, Npad), 1)

    s_max = jnp.max(dist_s, axis=-1, keepdims=True)
    o_max = jnp.max(dist_o, axis=-1, keepdims=True)
    # first-index argmax (== torch.max / jnp.argmax tie-break)
    s_id = jnp.min(jnp.where(dist_s == s_max, col, Npad), axis=-1, keepdims=True)
    o_id = jnp.min(jnp.where(dist_o == o_max, col, Npad), axis=-1, keepdims=True)

    # gather-at-argmax without a data-dependent gather: one-hot select + row sum
    s_sel = (col == s_id).astype(jnp.float32)          # (TR, Npad)
    o_sel = (col == o_id).astype(jnp.float32)
    s_sc_at = jnp.sum(s_sel * sc, axis=-1, keepdims=True)    # s_scores[rel_s_ids]
    o_sc_at = jnp.sum(o_sel * sc, axis=-1, keepdims=True)    # o_scores[rel_o_ids]
    o_cls_at = jnp.sum(o_sel * lb, axis=-1, keepdims=True)   # labels[rel_o_ids] (f32)

    # valid_hoi_mask = rel_array[:, o_cls - 1].T  ==  one_hot(o_cls - 1) @ rel_array.T
    # operands kept exactly {0,1} so the MXU matmul is exact in any precision mode.
    cpad = rel_arr_ref.shape[0]
    idx = o_cls_at.astype(jnp.int32) - 1
    idx = jnp.where(idx < 0, idx + num_obj, idx)       # emulate torch negative-index wrap
    c_iota = lax.broadcasted_iota(jnp.int32, (TR, cpad), 1)
    onehot = (c_iota == idx).astype(jnp.float32)       # (TR, Cpad)
    valid = jnp.dot(onehot, rel_arr_ref[...],
                    preferred_element_type=jnp.float32)  # (TR, Kpad), exact {0,1}

    so = s_sc_at * o_sc_at                              # (TR, 1) per-row scalar
    hoi_ref[...] = valid * (rel_prob_ref[...] * so)

    # lane-dense packed id output: lane0 = subject argmax, lane1 = object argmax
    lane = lax.broadcasted_iota(jnp.int32, ids_ref.shape, 1)
    ids_ref[...] = jnp.where(lane == 0, s_id, jnp.where(lane == 1, o_id, 0))


def fused_postprocess_pallas(rel_vec_p, det_slab, rel_prob_p, rel_arr_t, num_obj):
    """rel_vec_p (R_pad,128), det_slab (8,N_pad), rel_prob_p (R_pad,K_pad),
    rel_arr_t (C_pad,K_pad) -> (hoi (R_pad,K_pad) f32, ids (R_pad,128) i32)."""
    r_pad, lane_w = rel_vec_p.shape
    k_pad = rel_prob_p.shape[1]
    tr = 128 if r_pad >= 128 else 8
    assert r_pad % tr == 0
    grid = (r_pad // tr,)

    kernel = functools.partial(_fused_kernel, num_obj=num_obj)
    out_shape = (jax.ShapeDtypeStruct((r_pad, k_pad), jnp.float32),
                 jax.ShapeDtypeStruct((r_pad, 128), jnp.int32))

    grid_spec = pltpu.PrefetchScalarGridSpec(
        num_scalar_prefetch=0,
        grid=grid,
        in_specs=[
            pl.BlockSpec((tr, lane_w), lambda i: (i, 0)),        # rel_vec rows
            pl.BlockSpec(det_slab.shape, lambda i: (0, 0)),      # full det slab
            pl.BlockSpec((tr, k_pad), lambda i: (i, 0)),         # rel_prob rows
            pl.BlockSpec(rel_arr_t.shape, lambda i: (0, 0)),     # full rel_array.T
        ],
        out_specs=(
            pl.BlockSpec((tr, k_pad), lambda i: (i, 0)),
            pl.BlockSpec((tr, 128), lambda i: (i, 0)),
        ),
    )
    return pl.pallas_call(
        kernel,
        grid_spec=grid_spec,
        out_shape=out_shape,
        compiler_params=pltpu.CompilerParams(
            dimension_semantics=("parallel",)),
    )(rel_vec_p, det_slab, rel_prob_p, rel_arr_t)


# -----------------------------------------------------------------------------
# Glue (plain JAX): box conversions, softmax/sigmoid, scaling, padding
# -----------------------------------------------------------------------------
def box_cxcywh_to_xyxy(b):
    cx, cy, w, h = b[..., 0], b[..., 1], b[..., 2], b[..., 3]
    return jnp.stack([cx - 0.5 * w, cy - 0.5 * h, cx + 0.5 * w, cy + 0.5 * h], -1)


def box_xyxy_to_cxcywh(b):
    x0, y0, x1, y1 = b[..., 0], b[..., 1], b[..., 2], b[..., 3]
    return jnp.stack([(x0 + x1) / 2, (y0 + y1) / 2, x1 - x0, y1 - y0], -1)


def post_process(outputs_dict, file_name, target_sizes, rel_array,
                 rel_topk=20, sub_cls=1):
    outputs = outputs_dict['pred_det']
    out_logits, out_bbox = outputs['pred_logits'], outputs['pred_boxes']
    rel_outputs = outputs_dict['pred_rel']
    rel_out_logits, rel_out_bbox = rel_outputs['pred_logits'], rel_outputs['pred_boxes']
    # TODO(synk): use_emb=True path (scipy cdist on id embeddings) not implemented.

    img_h, img_w = target_sizes[:, 0], target_sizes[:, 1]
    scale_fct = jnp.stack([img_w, img_h, img_w, img_h], axis=1)          # (B, 4)

    out_bbox = out_bbox * scale_fct[:, None, :]
    out_bbox_flat = out_bbox.reshape(-1, 4)
    prob = jax.nn.softmax(out_logits, axis=-1)
    scores_flat = jnp.max(prob[..., :-1], axis=-1).reshape(-1)
    labels_flat = jnp.argmax(prob[..., :-1], axis=-1).reshape(-1)
    boxes = box_cxcywh_to_xyxy(out_bbox_flat)                            # (N, 4)
    cetr = box_xyxy_to_cxcywh(boxes)[..., :2]                            # (N, 2)
    # TODO(synk): original filters subject candidates (labels == sub_cls) into a
    # subset and early-returns when empty; here it is a static-shape multiplicative mask.
    s_mask = (labels_flat == sub_cls).astype(jnp.float32)

    rel_prob = jax.nn.sigmoid(rel_out_logits)
    topk = rel_prob.shape[-1]
    rel_scores = rel_prob.reshape(-1, topk)                              # (R, K)
    rel_vec = (rel_out_bbox * scale_fct[:, None, :]).reshape(-1, 4)      # (R, 4)

    n = boxes.shape[0]
    r = rel_vec.shape[0]
    k = topk
    c = rel_array.shape[1]                                               # num object classes

    n_pad = _round_up(n, 128)
    k_pad = _round_up(k, 128)
    c_pad = _round_up(c, 128)
    tr = 128 if r >= 128 else 8
    r_pad = _round_up(r, tr)

    # single (8, N_pad) f32 detection slab (zero padding => padded cols never win max)
    det_slab = jnp.zeros((8, n_pad), jnp.float32)
    det_slab = det_slab.at[0, :n].set(cetr[:, 0].astype(jnp.float32))
    det_slab = det_slab.at[1, :n].set(cetr[:, 1].astype(jnp.float32))
    det_slab = det_slab.at[2, :n].set(scores_flat.astype(jnp.float32))
    det_slab = det_slab.at[3, :n].set((scores_flat * s_mask).astype(jnp.float32))
    det_slab = det_slab.at[4, :n].set(labels_flat.astype(jnp.float32))

    rel_vec_p = jnp.zeros((r_pad, 128), jnp.float32).at[:r, :4].set(
        rel_vec.astype(jnp.float32))
    rel_prob_p = jnp.zeros((r_pad, k_pad), jnp.float32).at[:r, :k].set(
        rel_scores.astype(jnp.float32))
    rel_arr_t = jnp.zeros((c_pad, k_pad), jnp.float32).at[:c, :k].set(
        rel_array.T.astype(jnp.float32))

    # TODO(synk): for very large N, add an "arbitrary" N-grid axis with a running
    # max/argmax scratch (pl.when init/finalize) to bound per-step VMEM.
    hoi_pad, ids_pad = fused_postprocess_pallas(
        rel_vec_p, det_slab, rel_prob_p, rel_arr_t, num_obj=c)

    hoi_scores = hoi_pad[:r, :k]                                         # (R, K)
    rel_s_ids = ids_pad[:r, 0]                                           # (R,)
    rel_o_ids = ids_pad[:r, 1]                                           # (R,)

    # ---------------------------------------------------------------------------
    # Host-side tail (original code also drops to numpy here): sort / unique / topk
    # ---------------------------------------------------------------------------
    hoi_scores_np = np.asarray(hoi_scores).reshape(-1, 1)
    hoi_labels_np = np.tile(np.arange(topk) + 1, (r, 1)).reshape(-1, 1).astype(np.float32)
    rel_s_ids_np = np.repeat(np.asarray(rel_s_ids), topk).reshape(-1, 1).astype(np.float32)
    rel_o_ids_np = np.repeat(np.asarray(rel_o_ids), topk).reshape(-1, 1).astype(np.float32)
    hoi_triplet = np.concatenate(
        [rel_s_ids_np, rel_o_ids_np, hoi_labels_np, hoi_scores_np], axis=1)
    hoi_triplet = hoi_triplet[hoi_triplet[..., -1] > 0.0]
    if len(hoi_triplet) == 0:
        return ({'file_name': file_name, 'hoi_prediction': [], 'predictions': []},
                (hoi_scores, rel_s_ids, rel_o_ids))
    hoi_triplet = hoi_triplet[np.argsort(-hoi_triplet[:, -1])]
    _, hoi_id = np.unique(hoi_triplet[:, [0, 1, 2]], axis=0, return_index=True)
    rel_triplet = hoi_triplet[hoi_id]
    rel_triplet = rel_triplet[np.argsort(-rel_triplet[:, -1])]
    rel_triplet = rel_triplet[:min(rel_topk, len(rel_triplet))]

    out_labels, out_scores = rel_triplet[..., 2], rel_triplet[..., 3]
    sid = rel_triplet[..., 0].astype(np.int64)
    oid = rel_triplet[..., 1].astype(np.int64)
    boxes_np = np.asarray(boxes)
    labels_np = np.asarray(labels_flat)
    scores_np = np.asarray(scores_flat)

    pred_out = {'file_name': file_name, 'hoi_prediction': [], 'predictions': []}
    num_rel = len(out_labels)
    for i in range(num_rel):
        pred_out['hoi_prediction'].append(
            {'subject_id': i, 'object_id': i + num_rel,
             'category_id': out_labels[i], 'score': out_scores[i]})
    for i in range(num_rel):
        pred_out['predictions'].append(
            {'bbox': boxes_np[sid[i]], 'category_id': labels_np[sid[i]],
             'score': scores_np[sid[i]]})
    for i in range(num_rel):
        pred_out['predictions'].append(
            {'bbox': boxes_np[oid[i]], 'category_id': labels_np[oid[i]],
             'score': scores_np[oid[i]]})
    return pred_out, (hoi_scores, rel_s_ids, rel_o_ids)


# -----------------------------------------------------------------------------
# main
# -----------------------------------------------------------------------------
if __name__ == "__main__":
    key = jax.random.PRNGKey(0)
    B, Q, Qr = 2, 8, 8         # batch, det queries, rel queries
    C = 5                      # det classes (+1 no-object) -> logits dim 5
    K = 8                      # verb / relation classes
    E = 8                      # id-embedding dim (unused; use_emb=False)
    NUM_OBJ = C - 1

    ks = jax.random.split(key, 8)
    outputs_dict = {
        'pred_det': {
            'pred_logits': jax.random.normal(ks[0], (B, Q, C), jnp.float32),
            'pred_boxes':  jax.nn.sigmoid(jax.random.normal(ks[1], (B, Q, 4), jnp.float32)),
            'id_emb':      jax.random.normal(ks[2], (B, Q, E), jnp.float32),
        },
        'pred_rel': {
            'pred_logits': jax.random.normal(ks[3], (B, Qr, K), jnp.float32),
            'pred_boxes':  jax.nn.sigmoid(jax.random.normal(ks[4], (B, Qr, 4), jnp.float32)),
            'src_emb':     jax.random.normal(ks[5], (B, Qr, E), jnp.float32),
            'dst_emb':     jax.random.normal(ks[6], (B, Qr, E), jnp.float32),
        },
    }
    target_sizes = jnp.array([[480.0, 640.0], [360.0, 500.0]], jnp.float32)
    # deterministic stand-in for np.load(rel_array_path): (K, num_obj_classes) 0/1 mask
    rel_array = (jnp.arange(K * NUM_OBJ).reshape(K, NUM_OBJ) % 3 != 0).astype(jnp.float32)

    pred_out, (hoi_scores, rel_s_ids, rel_o_ids) = post_process(
        outputs_dict, "synthetic_000001.jpg", target_sizes, rel_array)
    jax.block_until_ready((hoi_scores, rel_s_ids, rel_o_ids))

    # ---- correctness check of the fused Pallas kernel against a pure-JAX reference ----
    scale_fct = jnp.stack([target_sizes[:, 1], target_sizes[:, 0],
                           target_sizes[:, 1], target_sizes[:, 0]], axis=1)
    boxes = box_cxcywh_to_xyxy(
        (outputs_dict['pred_det']['pred_boxes'] * scale_fct[:, None, :]).reshape(-1, 4))
    cetr = box_xyxy_to_cxcywh(boxes)[..., :2]
    prob = jax.nn.softmax(outputs_dict['pred_det']['pred_logits'], -1)
    scores_flat = jnp.max(prob[..., :-1], -1).reshape(-1)
    labels_flat = jnp.argmax(prob[..., :-1], -1).reshape(-1)
    s_mask = (labels_flat == 1).astype(jnp.float32)
    rel_vec = (outputs_dict['pred_rel']['pred_boxes'] * scale_fct[:, None, :]).reshape(-1, 4)
    rel_scores = jax.nn.sigmoid(outputs_dict['pred_rel']['pred_logits']).reshape(-1, K)

    dsx = jnp.abs(rel_vec[:, 0:1] - cetr[:, 0][None, :])
    dsy = jnp.abs(rel_vec[:, 1:2] - cetr[:, 1][None, :])
    dox = jnp.abs(rel_vec[:, 2:3] - cetr[:, 0][None, :])
    doy = jnp.abs(rel_vec[:, 3:4] - cetr[:, 1][None, :])
    ref_s = 1.0 / ((dsx + 1.0) * (dsy + 1.0)) * (scores_flat[None, :] * s_mask[None, :])
    ref_o = 1.0 / ((dox + 1.0) * (doy + 1.0)) * scores_flat[None, :]
    ref_s_ids = jnp.argmax(ref_s, axis=-1)
    ref_o_ids = jnp.argmax(ref_o, axis=-1)
    o_cls_ref = labels_flat[ref_o_ids]
    idx_ref = o_cls_ref - 1
    idx_ref = jnp.where(idx_ref < 0, idx_ref + NUM_OBJ, idx_ref)
    valid_ref = rel_array[:, idx_ref].T
    ref_hoi = (valid_ref * rel_scores
               * scores_flat[ref_s_ids][:, None] * scores_flat[ref_o_ids][:, None])

    np.testing.assert_array_equal(np.asarray(rel_s_ids), np.asarray(ref_s_ids))
    np.testing.assert_array_equal(np.asarray(rel_o_ids), np.asarray(ref_o_ids))
    np.testing.assert_allclose(np.asarray(hoi_scores), np.asarray(ref_hoi),
                               rtol=1e-5, atol=1e-6)
    assert isinstance(pred_out['hoi_prediction'], list)

    print("KERNEL_OK")
</pallas_src>

<mosaic_0001>
module attributes {stable_mosaic.version = 11 : i64} {
  func.func @_fused_kernel(%arg0: i32, %arg1: memref<8x128xf32, #tpu.memory_space<vmem>>, %arg2: memref<8x128xf32, #tpu.memory_space<vmem>>, %arg3: memref<8x128xf32, #tpu.memory_space<vmem>>, %arg4: memref<128x128xf32, #tpu.memory_space<vmem>>, %arg5: memref<8x128xf32, #tpu.memory_space<vmem>>, %arg6: memref<8x128xi32, #tpu.memory_space<vmem>>) attributes {dimension_semantics = [#tpu.dimension_semantics<parallel>], iteration_bounds = array<i64: 2>, scalar_prefetch = 0 : i64, scratch_operands = 0 : i64, tpu.core_type = #tpu.core_type<tc>, window_params = [{transform_indices = @transform_0, window_bounds = array<i64: 8, 128>}, {pipeline_mode = #tpu.pipeline_mode<synchronous>, transform_indices = @transform_1, window_bounds = array<i64: 8, 128>}, {transform_indices = @transform_2, window_bounds = array<i64: 8, 128>}, {pipeline_mode = #tpu.pipeline_mode<synchronous>, transform_indices = @transform_3, window_bounds = array<i64: 128, 128>}, {transform_indices = @transform_4, window_bounds = array<i64: 8, 128>}, {transform_indices = @transform_5, window_bounds = array<i64: 8, 128>}]} {
    %c0 = arith.constant 0 : index
    %c0_0 = arith.constant 0 : index
    %0 = vector.load %arg1[%c0, %c0_0] : memref<8x128xf32, #tpu.memory_space<vmem>>, vector<8x128xf32>
    %c0_1 = arith.constant 0 : index
    %c0_2 = arith.constant 0 : index
    %1 = vector.load %arg2[%c0_1, %c0_2] : memref<8x128xf32, #tpu.memory_space<vmem>>, vector<8x128xf32>
    %2 = vector.extract_strided_slice %1 {offsets = [0, 0], sizes = [1, 128], strides = [1, 1]} : vector<8x128xf32> to vector<1x128xf32>
    %3 = vector.extract_strided_slice %1 {offsets = [1, 0], sizes = [1, 128], strides = [1, 1]} : vector<8x128xf32> to vector<1x128xf32>
    %4 = vector.extract_strided_slice %1 {offsets = [2, 0], sizes = [1, 128], strides = [1, 1]} : vector<8x128xf32> to vector<1x128xf32>
    %5 = vector.extract_strided_slice %1 {offsets = [3, 0], sizes = [1, 128], strides = [1, 1]} : vector<8x128xf32> to vector<1x128xf32>
    %6 = vector.extract_strided_slice %1 {offsets = [4, 0], sizes = [1, 128], strides = [1, 1]} : vector<8x128xf32> to vector<1x128xf32>
    %7 = vector.extract_strided_slice %0 {offsets = [0, 0], sizes = [8, 1], strides = [1, 1]} : vector<8x128xf32> to vector<8x1xf32>
    %8 = vector.broadcast %7 : vector<8x1xf32> to vector<8x128xf32>
    %9 = vector.broadcast %2 : vector<1x128xf32> to vector<8x128xf32>
    %10 = arith.subf %8, %9 : vector<8x128xf32>
    %11 = math.absf %10 : vector<8x128xf32>
    %12 = vector.extract_strided_slice %0 {offsets = [0, 1], sizes = [8, 1], strides = [1, 1]} : vector<8x128xf32> to vector<8x1xf32>
    %13 = vector.broadcast %12 : vector<8x1xf32> to vector<8x128xf32>
    %14 = vector.broadcast %3 : vector<1x128xf32> to vector<8x128xf32>
    %15 = arith.subf %13, %14 : vector<8x128xf32>
    %16 = math.absf %15 : vector<8x128xf32>
    %17 = vector.extract_strided_slice %0 {offsets = [0, 2], sizes = [8, 1], strides = [1, 1]} : vector<8x128xf32> to vector<8x1xf32>
    %18 = vector.broadcast %17 : vector<8x1xf32> to vector<8x128xf32>
    %19 = vector.broadcast %2 : vector<1x128xf32> to vector<8x128xf32>
    %20 = arith.subf %18, %19 : vector<8x128xf32>
    %21 = math.absf %20 : vector<8x128xf32>
    %22 = vector.extract_strided_slice %0 {offsets = [0, 3], sizes = [8, 1], strides = [1, 1]} : vector<8x128xf32> to vector<8x1xf32>
    %23 = vector.broadcast %22 : vector<8x1xf32> to vector<8x128xf32>
    %24 = vector.broadcast %3 : vector<1x128xf32> to vector<8x128xf32>
    %25 = arith.subf %23, %24 : vector<8x128xf32>
    %26 = math.absf %25 : vector<8x128xf32>
    %cst = arith.constant 1.000000e+00 : f32
    %27 = vector.broadcast %cst : f32 to vector<8x128xf32>
    %28 = arith.addf %11, %27 : vector<8x128xf32>
    %cst_3 = arith.constant 1.000000e+00 : f32
    %29 = vector.broadcast %cst_3 : f32 to vector<8x128xf32>
    %30 = arith.addf %16, %29 : vector<8x128xf32>
    %31 = arith.mulf %28, %30 : vector<8x128xf32>
    %32 = tpu.reciprocal %31 : vector<8x128xf32> -> vector<8x128xf32>
    %33 = vector.broadcast %5 : vector<1x128xf32> to vector<8x128xf32>
    %34 = arith.mulf %32, %33 : vector<8x128xf32>
    %cst_4 = arith.constant 1.000000e+00 : f32
    %35 = vector.broadcast %cst_4 : f32 to vector<8x128xf32>
    %36 = arith.addf %21, %35 : vector<8x128xf32>
    %cst_5 = arith.constant 1.000000e+00 : f32
    %37 = vector.broadcast %cst_5 : f32 to vector<8x128xf32>
    %38 = arith.addf %26, %37 : vector<8x128xf32>
    %39 = arith.mulf %36, %38 : vector<8x128xf32>
    %40 = tpu.reciprocal %39 : vector<8x128xf32> -> vector<8x128xf32>
    %41 = vector.broadcast %4 : vector<1x128xf32> to vector<8x128xf32>
    %42 = arith.mulf %40, %41 : vector<8x128xf32>
    %43 = tpu.iota {dimensions = array<i32: 1>} : vector<8x128xi32>
    %cst_6 = arith.constant dense<0xFF800000> : vector<8xf32>
    %44 = vector.multi_reduction <maximumf>, %34, %cst_6 [1] : vector<8x128xf32> to vector<8xf32>
    %45 = vector.shape_cast %44 : vector<8xf32> to vector<8x1xf32>
    %cst_7 = arith.constant dense<0xFF800000> : vector<8xf32>
    %46 = vector.multi_reduction <maximumf>, %42, %cst_7 [1] : vector<8x128xf32> to vector<8xf32>
    %47 = vector.shape_cast %46 : vector<8xf32> to vector<8x1xf32>
    %48 = vector.broadcast %45 : vector<8x1xf32> to vector<8x128xf32>
    %49 = arith.cmpf oeq, %34, %48 : vector<8x128xf32>
    %c128_i32 = arith.constant 128 : i32
    %50 = vector.broadcast %c128_i32 : i32 to vector<8x128xi32>
    %51 = arith.select %49, %43, %50 : vector<8x128xi1>, vector<8x128xi32>
    %cst_8 = arith.constant dense<2147483647> : vector<8xi32>
    %52 = vector.multi_reduction <minsi>, %51, %cst_8 [1] : vector<8x128xi32> to vector<8xi32>
    %53 = vector.shape_cast %52 : vector<8xi32> to vector<8x1xi32>
    %54 = vector.broadcast %47 : vector<8x1xf32> to vector<8x128xf32>
    %55 = arith.cmpf oeq, %42, %54 : vector<8x128xf32>
    %c128_i32_9 = arith.constant 128 : i32
    %56 = vector.broadcast %c128_i32_9 : i32 to vector<8x128xi32>
    %57 = arith.select %55, %43, %56 : vector<8x128xi1>, vector<8x128xi32>
    %cst_10 = arith.constant dense<2147483647> : vector<8xi32>
    %58 = vector.multi_reduction <minsi>, %57, %cst_10 [1] : vector<8x128xi32> to vector<8xi32>
    %59 = vector.shape_cast %58 : vector<8xi32> to vector<8x1xi32>
    %60 = vector.broadcast %53 : vector<8x1xi32> to vector<8x128xi32>
    %61 = arith.cmpi eq, %43, %60 : vector<8x128xi32>
    %62 = arith.extui %61 : vector<8x128xi1> to vector<8x128xi32>
    %63 = arith.sitofp %62 : vector<8x128xi32> to vector<8x128xf32>
    %64 = vector.broadcast %59 : vector<8x1xi32> to vector<8x128xi32>
    %65 = arith.cmpi eq, %43, %64 : vector<8x128xi32>
    %66 = arith.extui %65 : vector<8x128xi1> to vector<8x128xi32>
    %67 = arith.sitofp %66 : vector<8x128xi32> to vector<8x128xf32>
    %68 = vector.broadcast %4 : vector<1x128xf32> to vector<8x128xf32>
    %69 = arith.mulf %63, %68 : vector<8x128xf32>
    %cst_11 = arith.constant dense<0.000000e+00> : vector<8xf32>
    %70 = vector.multi_reduction <add>, %69, %cst_11 [1] : vector<8x128xf32> to vector<8xf32>
    %71 = vector.shape_cast %70 : vector<8xf32> to vector<8x1xf32>
    %72 = vector.broadcast %4 : vector<1x128xf32> to vector<8x128xf32>
    %73 = arith.mulf %67, %72 : vector<8x128xf32>
    %cst_12 = arith.constant dense<0.000000e+00> : vector<8xf32>
    %74 = vector.multi_reduction <add>, %73, %cst_12 [1] : vector<8x128xf32> to vector<8xf32>
    %75 = vector.shape_cast %74 : vector<8xf32> to vector<8x1xf32>
    %76 = vector.broadcast %6 : vector<1x128xf32> to vector<8x128xf32>
    %77 = arith.mulf %67, %76 : vector<8x128xf32>
    %cst_13 = arith.constant dense<0.000000e+00> : vector<8xf32>
    %78 = vector.multi_reduction <add>, %77, %cst_13 [1] : vector<8x128xf32> to vector<8xf32>
    %79 = vector.shape_cast %78 : vector<8xf32> to vector<8x1xf32>
    %80 = arith.fptosi %79 : vector<8x1xf32> to vector<8x1xi32>
    %c1_i32 = arith.constant 1 : i32
    %81 = vector.broadcast %c1_i32 : i32 to vector<8x1xi32>
    %82 = arith.subi %80, %81 : vector<8x1xi32>
    %c0_i32 = arith.constant 0 : i32
    %83 = vector.broadcast %c0_i32 : i32 to vector<8x1xi32>
    %84 = arith.cmpi slt, %82, %83 : vector<8x1xi32>
    %c4_i32 = arith.constant 4 : i32
    %85 = vector.broadcast %c4_i32 : i32 to vector<8x1xi32>
    %86 = arith.addi %82, %85 : vector<8x1xi32>
    %87 = arith.select %84, %86, %82 : vector<8x1xi1>, vector<8x1xi32>
    %88 = tpu.iota {dimensions = array<i32: 1>} : vector<8x128xi32>
    %89 = vector.broadcast %87 : vector<8x1xi32> to vector<8x128xi32>
    %90 = arith.cmpi eq, %88, %89 : vector<8x128xi32>
    %91 = arith.extui %90 : vector<8x128xi1> to vector<8x128xi32>
    %92 = arith.sitofp %91 : vector<8x128xi32> to vector<8x128xf32>
    %c0_14 = arith.constant 0 : index
    %c0_15 = arith.constant 0 : index
    %93 = vector.load %arg4[%c0_14, %c0_15] : memref<128x128xf32, #tpu.memory_space<vmem>>, vector<128x128xf32>
    %cst_16 = arith.constant dense<0.000000e+00> : vector<8x128xf32>
    %94 = tpu.matmul %92, %93, %cst_16 {dimension_numbers = #tpu.dot_dimension_numbers<[1], [0], [0], [1], [0, 0, 1, 1], [], []>} : vector<8x128xf32>, vector<128x128xf32>, vector<8x128xf32> -> vector<8x128xf32>
    %95 = arith.mulf %71, %75 : vector<8x1xf32>
    %c0_17 = arith.constant 0 : index
    %c0_18 = arith.constant 0 : index
    %96 = vector.load %arg3[%c0_17, %c0_18] : memref<8x128xf32, #tpu.memory_space<vmem>>, vector<8x128xf32>
    %97 = vector.broadcast %95 : vector<8x1xf32> to vector<8x128xf32>
    %98 = arith.mulf %96, %97 : vector<8x128xf32>
    %99 = arith.mulf %94, %98 : vector<8x128xf32>
    %c0_19 = arith.constant 0 : index
    %c0_20 = arith.constant 0 : index
    %100 = vector.load %arg5[%c0_19, %c0_20] : memref<8x128xf32, #tpu.memory_space<vmem>>, vector<8x128xf32>
    tpu.vector_store %arg5[%c0_19, %c0_20], %99 {strides = array<i32>} : memref<8x128xf32, #tpu.memory_space<vmem>>, vector<8x128xf32>,
    %101 = tpu.iota {dimensions = array<i32: 1>} : vector<8x128xi32>
    %c0_i32_21 = arith.constant 0 : i32
    %102 = vector.broadcast %c0_i32_21 : i32 to vector<8x128xi32>
    %103 = arith.cmpi eq, %101, %102 : vector<8x128xi32>
    %c1_i32_22 = arith.constant 1 : i32
    %104 = vector.broadcast %c1_i32_22 : i32 to vector<8x128xi32>
    %105 = arith.cmpi eq, %101, %104 : vector<8x128xi32>
    %c0_i32_23 = arith.constant 0 : i32
    %106 = vector.shape_cast %59 : vector<8x1xi32> to vector<8x1xi32>
    %107 = vector.broadcast %106 : vector<8x1xi32> to vector<8x128xi32>
    %108 = vector.broadcast %c0_i32_23 : i32 to vector<8x128xi32>
    %109 = arith.select %105, %107, %108 : vector<8x128xi1>, vector<8x128xi32>
    %110 = vector.shape_cast %53 : vector<8x1xi32> to vector<8x1xi32>
    %111 = vector.broadcast %110 : vector<8x1xi32> to vector<8x128xi32>
    %112 = arith.select %103, %111, %109 : vector<8x128xi1>, vector<8x128xi32>
    %c0_24 = arith.constant 0 : index
    %c0_25 = arith.constant 0 : index
    %113 = vector.load %arg6[%c0_24, %c0_25] : memref<8x128xi32, #tpu.memory_space<vmem>>, vector<8x128xi32>
    tpu.vector_store %arg6[%c0_24, %c0_25], %112 {strides = array<i32>} : memref<8x128xi32, #tpu.memory_space<vmem>>, vector<8x128xi32>,
    return
  }
  func.func @transform_0(%arg0: i32) -> (i32, i32) {
    %c0_i32 = arith.constant 0 : i32
    %c0_i32_0 = arith.constant 0 : i32
    return %arg0, %c0_i32 : i32, i32
  }
  func.func @transform_1(%arg0: i32) -> (i32, i32) {
    %c0_i32 = arith.constant 0 : i32
    %c0_i32_0 = arith.constant 0 : i32
    %c0_i32_1 = arith.constant 0 : i32
    return %c0_i32, %c0_i32_0 : i32, i32
  }
  func.func @transform_2(%arg0: i32) -> (i32, i32) {
    %c0_i32 = arith.constant 0 : i32
    %c0_i32_0 = arith.constant 0 : i32
    return %arg0, %c0_i32 : i32, i32
  }
  func.func @transform_3(%arg0: i32) -> (i32, i32) {
    %c0_i32 = arith.constant 0 : i32
    %c0_i32_0 = arith.constant 0 : i32
    %c0_i32_1 = arith.constant 0 : i32
    return %c0_i32, %c0_i32_0 : i32, i32
  }
  func.func @transform_4(%arg0: i32) -> (i32, i32) {
    %c0_i32 = arith.constant 0 : i32
    %c0_i32_0 = arith.constant 0 : i32
    return %arg0, %c0_i32 : i32, i32
  }
  func.func @transform_5(%arg0: i32) -> (i32, i32) {
    %c0_i32 = arith.constant 0 : i32
    %c0_i32_0 = arith.constant 0 : i32
    return %arg0, %c0_i32 : i32, i32
  }
}

</mosaic_0001>

<bundles_post_ra>
// kernel: tpu_custom_call.1
= control target key start
LH: loop header
LB: loop body
LE: loop exit
PB: predicated region body
PF: predicated region fallthrough
CT: control target
= control target key end

     0   :  { %s1509_s0 = inlined_call_operand.hbm [shape: f32[16,128], index: 0, kind: input, shape index: {}]   ;;  %s1510_s1 = inlined_call_operand.hbm [shape: f32[8,128], index: 1, kind: input, shape index: {}]   ;;  %s1511_s2 = inlined_call_operand.hbm [shape: f32[16,128], index: 2, kind: input, shape index: {}]   ;;  %s1512_s3 = inlined_call_operand.hbm [shape: f32[128,128], index: 3, kind: input, shape index: {}]   ;;  %s1513_s4 = inlined_call_operand.hbm [shape: f32[16,128], index: 4, kind: output, shape index: {0}]   ;;  %s1514_s5 = inlined_call_operand.hbm [shape: s32[16,128], index: 5, kind: output, shape index: {1}]  }
   0x1   :  { %1525 = sst [smem:[#allocation20_spill]] %s1509_s0 }
   0x2   :  { %1526 = sst [smem:[#allocation21_spill]] %s1510_s1 }
   0x3   :  { %11 = vsyncpa [#allocation3], 0 }
   0x4   :  { %13 = vsyncpa [#allocation3 + $0x1], 0 }
   0x5   :  { %14 = vsyncpa [#allocation6], 0 }
   0x6   :  { %15 = vsyncpa [#allocation4], 0 }
   0x7   :  { %17 = vsyncpa [#allocation4 + $0x1], 0 }
   0x8   :  { %18 = vsyncpa [#allocation11], 0 }
   0x9   :  { %20 = vsyncpa [#allocation11 + $0x1], 0  ;;  %s1174_s18 = smov 0   ;;  %s1176_s19 = smov 0  }
   0xa   :  { %s1178_s20 = smov 0   ;;  %s1180_s21 = smov 0  }
   0xb LB: > { %1527 = sst [smem:[#allocation18_spill]] %s1122_s20  ;;  %s1195_s22 = sadd.s32 4294967295, %s1126_s21   ;;  %s1126_s21 = sphi %s1180_s21, %s1561_s21   ;;  %s1122_s20 = sphi %s1178_s20, %s1558_s20   ;;  %s1118_s19 = sphi %s1176_s19, %s1560_s19   ;;  %s1114_s18 = sphi %s1174_s18, %s1559_s18  }
   0xc   : > { %s699_s23 = sadd.s32 4294967294, %s1126_s21   ;;  %p46_p0 = scmp.ne.s32.totalorder %s1118_s19, %s1114_s18 }
   0xd   : > { %p1515_p1 = scmp.eq.s32.totalorder %s1195_s22, 0  ;;  %p144_p3 = scmp.eq.s32.totalorder %s699_s23, 1 }
   0xe   : > { %p700_p5 = scmp.ge.s32.totalorder %s1126_s21, 1  ;;  %p177_p7 = scmp.lt.s32.totalorder %s1126_s21, 3 }
   0xf   : > { %p1204_p4 = por %p1515_p1, %p46_p0  ;;  %p1209_p6 = por %p144_p3, %p46_p0 }
  0x10   : > { %p1214_p8 = pnand %p700_p5, %p177_p7  ;;  %s1128_s27 = smov [#allocation5]  }
  0x11   : > { %s1528_s24 = scalar_select %p1204_p4, 1, 0 }
  0x12   : > { %s1529_s25 = scalar_select %p1209_p6, 1, 0 }
  0x13   : > { %s1530_s26 = scalar_select %p1214_p8, 1, 0 }
  0x14   : > { %s190_s28 = sshll.u32 %s1128_s27, 4  ;;  %p820_p10 = pneg %p1214_p8  ;;  %s191_s28 = int_to_ptr.vmem [resolvable:$true] %s190_s28 }
  0x15   : > { %s1222_s29 = sadd.s32 1, %s1126_s21   ;;  %s33_s8 = sadd.s32 1, %s1122_s20 }
  0x16   : > { %p1226_p11 = pnand %p820_p10, %p1515_p1  ;;  %s30_s6 = ssub.s32 %s1126_s21, %s1222_s29 }
  0x17   : > { %p1232_p12 = scmp.eq.s32.totalorder %s30_s6, 0  ;;  %s1533_s1 = sld [smem:[#allocation21_spill]] }
  0x18   : > { %p1519_p3 = pneg %p1226_p11 }
  0x19   : > { %s1532_s7 = scalar_select %p1232_p12, 1, 0 }
  0x1d   : > { %s900_s11 = scalar_lea.hbm %s1533_s1, 128 }
  0x1e   : > { %p901_p0 = scmp.ne.s32.totalorder %s1533_s1, %s900_s11  ;;  %p907_p10 = scmp.lt.u32.totalorder %s900_s11, %s1533_s1 }
  0x20   : > { %p903_p5 = pnand %p1519_p3, %p901_p0 }
  0x22   : > { %p904_p7 = pneg %p903_p5 }
  0x24   : > { %p909_p9 = pnand %p907_p10, %p904_p7 }
  0x26   : > { %912 = shalt.err (!%p909_p9)
}
  0x27   : > { %s913_s16 = scalar_lea.vmem %s191_s28, 128  ;;  %p921_p6 = scmp.lt.s32.totalorder %s191_s28, %s191_s28 }
  0x28   : > { %p914_p1 = scmp.ne.s32.totalorder %s191_s28, %s913_s16  ;;  %p922_p4 = scmp.lt.s32.totalorder %s913_s16, %s913_s16 }
  0x2a   : > { %p916_p2 = pnand %p914_p1, %p1519_p3  ;;  %p923_p8 = por %p922_p4, %p921_p6 }
  0x2c   : > { %p917_p13 = pneg %p916_p2 }
  0x2e   : > { %p924_p12 = pnand %p923_p8, %p917_p13 }
  0x30   : > { %927 = shalt.err (!%p924_p12)
}
  0x31   : > { %823 = dma.hbm_to_vmem [thread:$0]  (!%p1226_p11), %s1533_s1, 128, %s191_s28, [#allocation6]  }
  0x32   : > { %p1534_p1 = scmp.ne.s32.totalorder %s1532_s7, 0  ;;  %p41_p2 = scmp.eq.s32.totalorder %s1126_s21, 0 }
  0x33   : > { %p1536_p4 = scmp.ne.s32.totalorder %s1122_s20, %s1118_s19  ;;  %p1537_p6 = scmp.eq.s32.totalorder %s1195_s22, 1 }
  0x34   : > { %s1264_s27 = scalar_select %p1534_p1, %s1122_s20, %s33_s8  }
  0x35   : > { %p1272_p8 = por %p1537_p6, %p1536_p4  ;;  %p843_p9 = scmp.lt.s32.totalorder %s1126_s21, 2 }
  0x36   : > { %1535 = sst [smem:[#allocation19_spill]] %s1264_s27  ;;  %s214_s9 = sand.u32 1, %s1126_s21  }
  0x37   : > { %s1538_s6 = scalar_select %p1272_p8, 1, 0 }
  0x38   : > { %p1539_p12 = pmov %p1536_p4  ;;  %s216_s10 = sand.u32 1, %s1122_s20  }
  0x39   : > { %s1518_s11 = sshll.u32 %s1126_s21, 7  ;;  %s1283_s12 = sshll.u32 %s216_s10, 3 }
  0x3a   : > { %p42_p13 = por %p41_p2, %p1539_p12  ;;  %s1540_s0 = sld [smem:[#allocation20_spill]] }
  0x3b   : > { %s218_s14 = scalar_lea.vmem [#allocation2], %s1283_s12  ;;  %s1299_s16 = scalar_lea.sflag [#allocation3], %s214_s9 }
  0x3c   : > { %p1292_p0 = pnand %p843_p9, %p42_p13  ;;  %s225_s15 = sshll.u32 %s218_s14, 4  ;;  %s1297_s15 = int_to_ptr.vmem [resolvable:$true] %s225_s15 }
  0x3e   : > { %s1541_s13 = scalar_select %p1292_p0, 1, 0 }
  0x3f   : > { %p1521_p7 = pneg %p1292_p0 }
  0x40   : > { %s1290_s8 = scalar_lea.hbm %s1540_s0, %s1518_s11  ;;  %s933_s28 = scalar_lea.hbm %s1540_s0, 256 }
  0x41   : > { %s928_s17 = scalar_lea.hbm %s1290_s8, 128  ;;  %p934_p2 = scmp.lt.u32.totalorder %s1290_s8, %s1540_s0 }
  0x42   : > { %p929_p5 = scmp.ne.s32.totalorder %s1290_s8, %s928_s17  ;;  %p935_p4 = scmp.lt.u32.totalorder %s933_s28, %s928_s17 }
  0x43   : > { %p937_p9 = scmp.lt.u32.totalorder %s928_s17, %s1290_s8 }
  0x44   : > { %p931_p10 = pnand %p1521_p7, %p929_p5  ;;  %p936_p6 = por %p935_p4, %p934_p2 }
  0x46   : > { %p932_p1 = pneg %p931_p10  ;;  %p938_p12 = por %p937_p9, %p936_p6 }
  0x48   : > { %p939_p13 = pnand %p938_p12, %p932_p1 }
  0x4a   : > { %942 = shalt.err (!%p939_p13)
}
  0x4b   : > { %s943_s9 = scalar_lea.vmem %s1297_s15, 128  ;;  %s1129_s14 = smov [#allocation2]  }
  0x4c   : > { %p944_p5 = scmp.ne.s32.totalorder %s1297_s15, %s943_s9  ;;  %s948_s23 = sshll.u32 %s1129_s14, 4  ;;  %s949_s23 = int_to_ptr.vmem [resolvable:$false] %s948_s23 }
  0x4d   : > { %s950_s11 = scalar_lea.vmem %s949_s23, 256  ;;  %p951_p8 = scmp.lt.s32.totalorder %s1297_s15, %s949_s23 }
  0x4e   : > { %p946_p10 = pnand %p944_p5, %p1521_p7  ;;  %p952_p2 = scmp.lt.s32.totalorder %s950_s11, %s943_s9 }
  0x50   : > { %p947_p3 = pneg %p946_p10  ;;  %p953_p4 = por %p952_p2, %p951_p8 }
  0x52   : > { %p954_p6 = pnand %p953_p4, %p947_p3 }
  0x54   : > { %957 = shalt.err (!%p954_p6)
}
  0x55   : > { %830 = dma.hbm_to_vmem [thread:$0]  (!%p1292_p0), %s1290_s8, 128, %s1297_s15, %s1299_s16  }
  0x56   : > { %s1542_s17 = sshll.u32 %s1126_s21, 7  ;;  %s1130_s14 = smov [#allocation8]  }
  0x57   : > { %s1332_s7 = scalar_lea.hbm %s1511_s2, %s1542_s17  ;;  %s200_s23 = sshll.u32 %s1130_s14, 4  ;;  %s201_s23 = int_to_ptr.vmem [resolvable:$true] %s200_s23 }
  0x58   : > { %s958_s0 = scalar_lea.hbm %s1512_s3, 2048  ;;  %p1543_p8 = pneg %p1226_p11 }
  0x59   : > { %p959_p3 = scmp.ne.s32.totalorder %s1512_s3, %s958_s0  ;;  %p965_p12 = scmp.lt.u32.totalorder %s958_s0, %s1512_s3 }
  0x5b   : > { %p961_p1 = pnand %p959_p3, %p1543_p8 }
  0x5d   : > { %p962_p9 = pneg %p961_p1 }
  0x5f   : > { %p967_p13 = pnand %p965_p12, %p962_p9 }
  0x61   : > { %970 = shalt.err (!%p967_p13)
}
  0x62   : > { %s971_s17 = scalar_lea.vmem %s201_s23, 2048  ;;  %p1544_p10 = pmov %p1543_p8 }
  0x63   : > { %p972_p5 = scmp.ne.s32.totalorder %s201_s23, %s971_s17  ;;  %p979_p6 = scmp.lt.s32.totalorder %s201_s23, %s201_s23 }
  0x64   : > { %p980_p7 = scmp.lt.s32.totalorder %s971_s17, %s971_s17 }
  0x65   : > { %p974_p2 = pnand %p972_p5, %p1544_p10 }
  0x66   : > { %p981_p0 = por %p980_p7, %p979_p6 }
  0x67   : > { %p975_p4 = pneg %p974_p2 }
  0x69   : > { %p982_p3 = pnand %p981_p0, %p975_p4 }
  0x6b   : > { %985 = shalt.err (!%p982_p3)
}
  0x6c   : > { %s1131_s1 = smov 128   ;;  %s1132_s0 = smov 8  }
  0x6d   : > { %826 = dma.hbm_to_vmem [thread:$0]  (!%p1226_p11), %s1512_s3, 2048, %s201_s23, [#allocation6], %s1131_s1, %s1131_s1, %s1132_s0  }
  0x6e   : > { %s236_s28 = scalar_lea.vmem [#allocation7], %s1283_s12  ;;  %s986_s9 = scalar_lea.hbm %s1332_s7, 128 }
  0x6f   : > { %s243_s14 = sshll.u32 %s236_s28, 4  ;;  %p987_p0 = scmp.ne.s32.totalorder %s1332_s7, %s986_s9  ;;  %s244_s14 = int_to_ptr.vmem [resolvable:$true] %s243_s14 }
  0x70   : > { %p1545_p7 = scmp.ne.s32.totalorder %s1541_s13, 0  ;;  %s991_s15 = scalar_lea.hbm %s1511_s2, 256 }
  0x71   : > { %p992_p12 = scmp.lt.u32.totalorder %s1332_s7, %s1511_s2  ;;  %p993_p13 = scmp.lt.u32.totalorder %s991_s15, %s986_s9 }
  0x72   : > { %p1546_p8 = pneg %p1545_p7  ;;  %p995_p11 = scmp.lt.u32.totalorder %s986_s9, %s1332_s7 }
  0x73   : > { %p994_p5 = por %p993_p13, %p992_p12 }
  0x74   : > { %p989_p1 = pnand %p987_p0, %p1546_p8 }
  0x75   : > { %p996_p10 = por %p995_p11, %p994_p5 }
  0x76   : > { %p990_p9 = pneg %p989_p1 }
  0x78   : > { %p997_p2 = pnand %p996_p10, %p990_p9 }
  0x7a   : > { %1000 = shalt.err (!%p997_p2)
}
  0x7b   : > { %s1001_s30 = scalar_lea.vmem %s244_s14, 128  ;;  %p1547_p6 = pmov %p1546_p8 }
  0x7c   : > { %p1002_p4 = scmp.ne.s32.totalorder %s244_s14, %s1001_s30  ;;  %s1133_s12 = smov [#allocation7]  }
  0x7d   : > { %s1006_s23 = sshll.u32 %s1133_s12, 4  ;;  %s1007_s23 = int_to_ptr.vmem [resolvable:$false] %s1006_s23 }
  0x7e   : > { %p1004_p3 = pnand %p1002_p4, %p1547_p6  ;;  %s1008_s1 = scalar_lea.vmem %s1007_s23, 256 }
  0x7f   : > { %p1009_p8 = scmp.lt.s32.totalorder %s244_s14, %s1007_s23  ;;  %p1010_p1 = scmp.lt.s32.totalorder %s1008_s1, %s1001_s30 }
  0x80   : > { %p1005_p0 = pneg %p1004_p3 }
  0x81   : > { %p1011_p12 = por %p1010_p1, %p1009_p8 }
  0x83   : > { %p1012_p13 = pnand %p1011_p12, %p1005_p0 }
  0x85   : > { %1015 = shalt.err (!%p1012_p13)
}
  0x86   : > { %833 = dma.hbm_to_vmem [thread:$0]  (!%p1545_p7), %s1332_s7, 128, %s244_s14, %s1299_s16  }
  0x87   : > { %p1548_p9 = scmp.ne.s32.totalorder %s1530_s26, 0 }
  0x88   : > { %s254_s20 = sand.u32 (!%p1548_p9), 1, %s1195_s22   ;;  %s1379_s0 = sand.u32 (!%p1548_p9), 1, %s1118_s19  }
  0x89   : > { %252 = sbr.rel (%p1548_p9) target bundleno = 1229 (0x4cd), region = 36  ;;  %s1382_s27 = sshll.u32 (!%p1548_p9), %s1379_s0, 3 }
  0x8a   : > { %s255_s10 = scalar_lea.sflag (!%p1548_p9), [#allocation3], %s254_s20  ;;  %s258_s28 = scalar_lea.vmem (!%p1548_p9), [#allocation2], %s1382_s27 }
  0x8b   : > { %p1549_p5 = scmp.ne.s32.totalorder (!%p1548_p9), %s1528_s24, 0 }
  0x90   : > { %1089 = dma.done.wait (%p1549_p5), %s255_s10, 128  }
  0x91   : > { %1091 = vsyncadd (%p1549_p5), %s255_s10, 4294967168  ;;  %p1550_p7 = scmp.eq.s32.totalorder %s1195_s22, 0 }
  0x93   : > { %1093 = dma.done.wait (%p1550_p7), [#allocation6], 128   ;;  %p1551_p11 = pmov %p1550_p7 }
  0x94   : > { %s271_s26 = scalar_lea.vmem [#allocation7], %s1382_s27 }
  0x95   : > { %1095 = vsyncadd (%p1551_p11), [#allocation6], 4294967168 }
  0x96   : > { %1097 = dma.done.wait (%p1549_p5), %s255_s10, 128  }
  0x97   : > { %1099 = vsyncadd (%p1549_p5), %s255_s10, 4294967168  ;;  %p1552_p10 = pmov %p1550_p7 }
  0x98   : > { %p1553_p2 = pmov %p1550_p7 }
  0x99   : > { %1101 = dma.done.wait (%p1552_p10), [#allocation6], 2048  }
  0x9a   : > { %1103 = vsyncadd (%p1553_p2), [#allocation6], 4294965248  ;;  %v1134_v0 = vmov 2   ;;  %v312_v1 = vld [vmem:[%s258_s28] sm:$0xff]  ;;  %v1135_v2 = vmov 3   ;;  %v319_v3 = vlaneseq  ;;  %v1405_v6 = vld [vmem:[#allocation5] sm:$0xff] }
  0x9b   : > { %891 = vset.pattern.permute.xlu0 %v1134_v0  ;;  %v1136_v23 = vmov 0   ;;  %v1137_v24 = vmov 1   ;;  %v430_v47 = vld [vmem:[#allocation8] sm:$0xff]  ;;  %v431_v48 = vld [vmem:[#allocation8 + $0x8] sm:$0xff]  ;;  %v432_v49 = vld [vmem:[#allocation8 + $0x10] sm:$0xff]  ;;  %v1138_v50 = vmov 0.0|0.0  }
  0x9c   : > { %336 = vperm.xlu0 %891, %v312_v1   ;;  %v1402_v4 = vshrl.u32 %v319_v3, 7  ;;  %893 = vset.pattern.permute.xlu1 %v1136_v23  ;;  %v1415_v25 = vand.u32 127, %v319_v3  ;;  %v779_v51 = vpack.c.bf16 %v431_v48, %v430_v47  ;;  %v433_v52 = vld [vmem:[#allocation8 + $0x18] sm:$0xff]  ;;  %v434_v54 = vld [vmem:[#allocation8 + $0x20] sm:$0xff]  ;;  %v435_v55 = vld [vmem:[#allocation8 + $0x28] sm:$0xff]  ;;  %vm1140_vm4 = vmmov 0  }
  0x9d   : > { %778 = vmatprep.subr.bf16.mxu0 %v1138_v50  ;;  %v782_v53 = vpack.c.bf16 %v433_v52, %v432_v49  ;;  %v785_v56 = vpack.c.bf16 %v435_v55, %v434_v54  ;;  %v436_v57 = vld [vmem:[#allocation8 + $0x30] sm:$0xff]  ;;  %v437_v58 = vld [vmem:[#allocation8 + $0x38] sm:$0xff]  ;;  %v438_v60 = vld [vmem:[#allocation8 + $0x40] sm:$0xff]  ;;  %s311_s24 = scalar_lea.vmem [#allocation10], %s1382_s27  ;;  %s722_s13 = sshll.u32 %s1195_s22, 7 }
  0x9e   : > { %v321_v5 = vsub.s32 0, %v1402_v4  ;;  %v331_v8 = vsub.s32 1, %v1402_v4  ;;  %v362_v19 = vsub.s32 2, %v1402_v4  ;;  %v353_v43 = vsub.s32 3, %v1402_v4  ;;  %780 = vmatpush3.bf16.msra.mxu0 %v779_v51  ;;  %v439_v61 = vld [vmem:[#allocation8 + $0x48] sm:$0xff]  ;;  %v440_v63 = vld [vmem:[#allocation8 + $0x50] sm:$0xff]  ;;  %s1437_s14 = scalar_lea.hbm %s1514_s5, %s722_s13 }
  0x9f   : > { %781 = vmatprep.subr.bf16.mxu0 %v1138_v50  ;;  %v788_v59 = vpack.c.bf16 %v437_v58, %v436_v57  ;;  %v791_v62 = vpack.c.bf16 %v439_v61, %v438_v60  ;;  %v441_v0 = vld [vmem:[#allocation8 + $0x58] sm:$0xff]  ;;  %v417_v3 = vsub.s32 4, %v1402_v4  ;;  %vm522_vm8 = vcmp.eq.s32.totalorder %v1415_v25, 1  ;;  %s558_s9 = sshll.u32 %s311_s24, 4  ;;  %s532_s11 = scalar_lea.sflag [#allocation11], %s1379_s0  ;;  %s559_s9 = int_to_ptr.vmem [resolvable:$true] %s558_s9 }
  0xa0   : > { %892 = vset.pattern.permute.xlu0 %v1135_v2  ;;  %v322_v7 = vrot.slane %v1405_v6, %v321_v5  ;;  %v332_v11 = vrot.slane %v1405_v6, %v331_v8  ;;  %v1412_v20 = vrot.slane %v1405_v6, %v362_v19  ;;  %v354_v44 = vrot.slane %v1405_v6, %v353_v43  ;;  %v444_v19 = vld [vmem:[#allocation8 + $0x70] sm:$0xff]  ;;  %s1016_s8 = scalar_lea.vmem %s559_s9, 128  ;;  %p1554_p6 = scmp.ne.s32.totalorder %s1538_s6, 0 }
  0xa1   : > { %342 = vperm.xlu0 %892, %v312_v1   ;;  %vm521_vm9 = vcmp.eq.s32.totalorder %v1415_v25, 0  ;;  %p1017_p4 = scmp.ne.s32.totalorder %s559_s9, %s1016_s8  ;;  %s1142_s15 = smov [#allocation10]  }
  0xa2   : > { %783 = vmatpush3.bf16.msra.mxu0 %v782_v53  ;;  %s1020_s17 = sshll.u32 %s1142_s15, 4  ;;  %s1021_s17 = int_to_ptr.vmem [resolvable:$false] %s1020_s17 }
  0xa3   : > { %784 = vmatprep.subr.bf16.mxu0 %v1138_v50  ;;  %p1018_p3 = pnand %p1017_p4, %p1554_p6  ;;  %s1022_s30 = scalar_lea.vmem %s1021_s17, 256 }
  0xa4   : > { %p1023_p8 = scmp.lt.s32.totalorder %s559_s9, %s1021_s17  ;;  %p1024_p1 = scmp.lt.s32.totalorder %s1022_s30, %s1016_s8 }
  0xa5   : > { %894 = vset.pattern.permute.xlu0 %v1137_v24  ;;  %p1019_p0 = pneg %p1018_p3 }
  0xa6   : > { %326 = vperm.xlu0 %894, %v312_v1   ;;  %786 = vmatpush3.bf16.msra.mxu0 %v785_v56  ;;  %p1025_p12 = por %p1024_p1, %p1023_p8 }
  0xa7   : > { %787 = vmatprep.subr.bf16.mxu0 %v1138_v50 }
  0xa8   : > { %p1026_p13 = pnand %p1025_p12, %p1019_p0 }
  0xaa   : > { %895 = vset.pattern.permute.xlu0 %v1135_v2  ;;  %789 = vmatpush3.bf16.msra.mxu0 %v788_v59 }
  0xab   : > { %790 = vmatprep.subr.bf16.mxu0 %v1138_v50 }
  0xae   : > { %792 = vmatpush3.bf16.msra.mxu0 %v791_v62 }
  0xaf   : > { %793 = vmatprep.subr.bf16.mxu0 %v1138_v50 }
 0x11b   : > { %v337_v9 = vpop.permute.xlu0 %336 }
 0x11c   : > { %v339_v10 = vsub.f32 %v337_v9, %v322_v7 }
 0x11e   : > { %v340_v13 = vand.u32 2147483647, %v339_v10  ;;  %v418_v10 = vrot.slane %v1405_v6, %v417_v3 }
 0x120   : > { %v343_v12 = vpop.permute.xlu0 %342  ;;  %v356_v16 = vadd.f32 1.0, %v340_v13 }
 0x121   : > { %v345_v14 = vsub.f32 %v343_v12, %v332_v11 }
 0x123   : > { %v346_v15 = vand.u32 2147483647, %v345_v14 }
 0x125   : > { %v357_v17 = vadd.f32 1.0, %v346_v15  ;;  %v327_v31 = vpop.permute.xlu0 %326  ;;  %v442_v15 = vld [vmem:[#allocation8 + $0x60] sm:$0xff] }
 0x126   : > { %v333_v32 = vsub.f32 %v327_v31, %v332_v11  ;;  %v1139_v11 = vmov 0.0  }
 0x127   : > { %v358_v18 = vmul.f32 %v357_v17, %v356_v16  ;;  %v443_v16 = vld [vmem:[#allocation8 + $0x68] sm:$0xff]  ;;  %775 = vmatprep.mubr.msk.f32.mxu0 %vm1140_vm4, %v1139_v11 }
 0x128   : > { %v334_v36 = vand.u32 2147483647, %v333_v32  ;;  %v797_v17 = vpack.c.bf16 %v443_v16, %v442_v15 }
 0x129   : > { %896 = vrcp.f32 %v358_v18 }
 0x12a   : > { %v348_v40 = vadd.f32 1.0, %v334_v36 }
 0x133   : > { %v897_v21 = vpop.eup %896 }
 0x134   : > { %v364_v22 = vmul.f32 %v897_v21, %v1412_v20  ;;  %v445_v21 = vld [vmem:[#allocation8 + $0x78] sm:$0xff] }
 0x135   : > { %v800_v6 = vpack.c.bf16 %v445_v21, %v444_v19 }
 0x136   : > { %369 = vmax.xlane.f32.xlu1 %v364_v22 }
 0x1c3   : > { %v370_v26 = vpop.xlane.xlu1 %369 }
 0x1c4   : > { %vm387_vm0 = vcmp.eq.f32.partialorder %v364_v22, %v370_v26 }
 0x1c5   : > { %v388_v27 = vsel %vm387_vm0, %v1415_v25, 128 }
 0x1c6   : > { %v390_v28 = vshra.s32 %v388_v27, 16  ;;  %v389_v30 = vand.u32 65535, %v388_v27 }
 0x1c8   : > { %v392_v29 = vcvt.s32.f32 %v390_v28  ;;  %v391_v34 = vcvt.s32.f32 %v389_v30  ;;  %v1141_v30 = vmov 1.0  }
 0x1ca   : > { %393 = vmin.xlane.f32.xlu1 %v392_v29 }
 0x1db   : > { %316 = vperm.xlu1 %893, %v312_v1   ;;  %v794_v1 = vpack.c.bf16 %v441_v0, %v440_v63 }
 0x1dd   : > { %795 = vmatpush3.bf16.msra.mxu0 %v794_v1 }
 0x1de   : > { %796 = vmatprep.subr.bf16.mxu0 %v1138_v50 }
 0x1e1   : > { %798 = vmatpush3.bf16.msra.mxu0 %v797_v17 }
 0x1e2   : > { %799 = vmatprep.subr.bf16.mxu0 %v1138_v50 }
 0x1e5   : > { %801 = vmatpush3.bf16.msra.mxu0 %v800_v6 }
 0x257   : > { %v394_v33 = vpop.xlane.xlu1 %393 }
 0x258   : > { %vm395_vm1 = vcmp.eq.f32.partialorder %v392_v29, %v394_v33  ;;  %v400_v2 = vcvt.f32.s32 %v394_v33 }
 0x259   : > { %v396_v35 = vsel %vm395_vm1, %v391_v34, inf }
 0x25a   : > { %397 = vmin.xlane.f32.xlu0 %v396_v35 }
 0x25b   : > { %v317_v37 = vpop.permute.xlu1 %316 }
 0x25c   : > { %v323_v38 = vsub.f32 %v317_v37, %v322_v7  ;;  %v401_v7 = vshll.u32 %v400_v2, 16 }
 0x25e   : > { %v324_v39 = vand.u32 2147483647, %v323_v38 }
 0x260   : > { %v347_v41 = vadd.f32 1.0, %v324_v39 }
 0x262   : > { %v349_v42 = vmul.f32 %v348_v40, %v347_v41 }
 0x264   : > { %898 = vrcp.f32 %v349_v42 }
 0x26e   : > { %v899_v45 = vpop.eup %898 }
 0x26f   : > { %v355_v46 = vmul.f32 %v899_v45, %v354_v44 }
 0x271   : > { %367 = vmax.xlane.f32.xlu1 %v355_v46 }
 0x2e7   : > { %v398_v5 = vpop.xlane.xlu0 %397 }
 0x2e8   : > { %v399_v8 = vcvt.f32.s32 %v398_v5 }
 0x2ea   : > { %v402_v9 = vadd.s32 %v401_v7, %v399_v8 }
 0x2ec   : > { %vm406_vm2 = vcmp.eq.s32.totalorder %v1415_v25, %v402_v9  ;;  %v523_v41 = vsel %vm522_vm8, %v402_v9, 0 }
 0x2ed   : > { %v716_v12 = vsel %vm406_vm2, 1.0, %v1139_v11 }
 0x2ee   : > { %v419_v13 = vmul.f32 %v716_v12, %v418_v10  ;;  %v412_v35 = vmul.f32 %v716_v12, %v1412_v20 }
 0x2f0   : > { %420 = vadd.xlane.f32.xlu0 %v419_v13 }
 0x2fe   : > { %v368_v14 = vpop.xlane.xlu1 %367 }
 0x2ff   : > { %vm371_vm3 = vcmp.eq.f32.partialorder %v355_v46, %v368_v14 }
 0x300   : > { %v372_v18 = vsel %vm371_vm3, %v1415_v25, 128 }
 0x301   : > { %v374_v4 = vshra.s32 %v372_v18, 16  ;;  %v373_v31 = vand.u32 65535, %v372_v18 }
 0x303   : > { %v376_v22 = vcvt.s32.f32 %v374_v4  ;;  %v375_v33 = vcvt.s32.f32 %v373_v31 }
 0x305   : > { %377 = vmin.xlane.f32.xlu0 %v376_v22 }
 0x37d   : > { %v421_v23 = vpop.xlane.xlu0 %420 }
 0x37e   : > { %v802_v24 = vtrunc.f32 %v421_v23 }
 0x380   : > { %v803_v26 = vcvt.f32.s32 %v802_v24 }
 0x382   : > { %v717_v27 = vadd.s32 4294967295, %v803_v26 }
 0x384   : > { %vm424_vm5 = vcmp.lt.s32.totalorder %v717_v27, 0  ;;  %v425_v28 = vadd.s32 4, %v717_v27 }
 0x386   : > { %v426_v29 = vsel %vm424_vm5, %v425_v28, %v717_v27 }
 0x387   : > { %vm427_vm6 = vcmp.eq.s32.totalorder %v1415_v25, %v426_v29 }
 0x388   : > { %776 = vmatmul.mubr.msk.f32.vlgmr.msra.gmra.mrb[0].mxu0 %vm427_vm6, %v1141_v30 }
 0x392   : > { %v378_v32 = vpop.xlane.xlu0 %377 }
 0x393   : > { %vm379_vm7 = vcmp.eq.f32.partialorder %v376_v22, %v378_v32  ;;  %v384_v36 = vcvt.f32.s32 %v378_v32 }
 0x394   : > { %v380_v34 = vsel %vm379_vm7, %v375_v33, inf }
 0x395   : > { %381 = vmin.xlane.f32.xlu0 %v380_v34  ;;  %v385_v38 = vshll.u32 %v384_v36, 16 }
 0x399   : > { %413 = vadd.xlane.f32.xlu0 %v412_v35 }
 0x422   : > { %v382_v37 = vpop.xlane.xlu0 %381 }
 0x423   : > { %v383_v39 = vcvt.f32.s32 %v382_v37 }
 0x425   : > { %v386_v40 = vadd.s32 %v385_v38, %v383_v39 }
 0x427   : > { %v524_v42 = vsel %vm521_vm9, %v386_v40, %v523_v41  ;;  %vm403_vm10 = vcmp.eq.s32.totalorder %v1415_v25, %v386_v40 }
 0x428   : > { %v715_v43 = vsel %vm403_vm10, 1.0, %v1139_v11  ;;  %525 = vst [vmem:[%s311_s24] sm:$0xff] %v524_v42 }
 0x429   : > { %v409_v44 = vmul.f32 %v715_v43, %v1412_v20 }
 0x42b   : > { %410 = vadd.xlane.f32.xlu1 %v409_v44 }
 0x42c   : > { %1029 = shalt.err (!%p1026_p13)
}
 0x42d   : > { %s1030_s12 = scalar_lea.hbm %s1437_s14, 128  ;;  %s1034_s20 = scalar_lea.hbm %s1514_s5, 256 }
 0x42e   : > { %p1031_p9 = scmp.ne.s32.totalorder %s1437_s14, %s1030_s12  ;;  %p1035_p11 = scmp.lt.u32.totalorder %s1437_s14, %s1514_s5 }
 0x42f   : > { %p1036_p10 = scmp.lt.u32.totalorder %s1034_s20, %s1030_s12  ;;  %p1038_p4 = scmp.lt.u32.totalorder %s1030_s12, %s1437_s14 }
 0x430   : > { %p1032_p5 = pnand %p1031_p9, %p1554_p6 }
 0x431   : > { %p1037_p2 = por %p1036_p10, %p1035_p11 }
 0x432   : > { %p1033_p7 = pneg %p1032_p5 }
 0x433   : > { %p1039_p3 = por %p1038_p4, %p1037_p2 }
 0x435   : > { %p1040_p0 = pnand %p1039_p3, %p1033_p7 }
 0x437   : > { %1043 = shalt.err (!%p1040_p0)
}
 0x438   : > { %817 = dma.vmem_to_hbm [thread:$0]  (%p1554_p6), %s559_s9, 128, %s1437_s14, %s532_s11   ;;  %v414_v45 = vpop.xlane.xlu0 %413  ;;  %v517_v46 = vld [vmem:[%s271_s26] sm:$0xff] }
 0x439   : > { %s304_s24 = scalar_lea.vmem [#allocation9], %s1382_s27  ;;  %s1465_s15 = scalar_lea.hbm %s1513_s4, %s722_s13 }
 0x43a   : > { %s545_s16 = sshll.u32 %s304_s24, 4  ;;  %s527_s14 = scalar_lea.sflag [#allocation4], %s1379_s0  ;;  %s1467_s16 = int_to_ptr.vmem [resolvable:$true] %s545_s16 }
 0x43b   : > { %s1044_s26 = scalar_lea.vmem %s1467_s16, 128  ;;  %s1143_s27 = smov [#allocation9]  }
 0x43c   : > { %p1045_p8 = scmp.ne.s32.totalorder %s1467_s16, %s1044_s26  ;;  %s1048_s9 = sshll.u32 %s1143_s27, 4  ;;  %s1049_s9 = int_to_ptr.vmem [resolvable:$false] %s1048_s9 }
 0x43d   : > { %s1050_s22 = scalar_lea.vmem %s1049_s9, 256  ;;  %p1051_p13 = scmp.lt.s32.totalorder %s1467_s16, %s1049_s9 }
 0x43e   : > { %p1046_p1 = pnand %p1045_p8, %p1554_p6  ;;  %p1052_p9 = scmp.lt.s32.totalorder %s1050_s22, %s1044_s26 }
 0x440   : > { %p1047_p12 = pneg %p1046_p1  ;;  %p1053_p5 = por %p1052_p9, %p1051_p13 }
 0x442   : > { %p1054_p7 = pnand %p1053_p5, %p1047_p12 }
 0x45b   : > { %v512_v20 = vpop.f32.mrb[0].mxu0 }
 0x45c   : > { %v777_v25 = vpop.f32.mrb[1].mxu0 }
 0x4b8   : > { %v411_v47 = vpop.xlane.xlu1 %410 }
 0x4b9   : > { %v516_v48 = vmul.f32 %v414_v45, %v411_v47 }
 0x4bb   : > { %v518_v49 = vmul.f32 %v517_v46, %v516_v48 }
 0x4bd   : > { %v519_v50 = vmul.f32 %v518_v49, %v512_v20 }
 0x4bf   : > { %520 = vst [vmem:[%s304_s24] sm:$0xff] %v519_v50 }
 0x4c0   : > { %1057 = shalt.err (!%p1054_p7)
}
 0x4c1   : > { %s1058_s0 = scalar_lea.hbm %s1465_s15, 128  ;;  %s1062_s17 = scalar_lea.hbm %s1513_s4, 256 }
 0x4c2   : > { %p1059_p11 = scmp.ne.s32.totalorder %s1465_s15, %s1058_s0  ;;  %p1063_p4 = scmp.lt.u32.totalorder %s1465_s15, %s1513_s4 }
 0x4c3   : > { %p1064_p3 = scmp.lt.u32.totalorder %s1062_s17, %s1058_s0  ;;  %p1066_p8 = scmp.lt.u32.totalorder %s1058_s0, %s1465_s15 }
 0x4c4   : > { %p1060_p10 = pnand %p1059_p11, %p1554_p6 }
 0x4c5   : > { %p1065_p0 = por %p1064_p3, %p1063_p4 }
 0x4c6   : > { %p1061_p2 = pneg %p1060_p10 }
 0x4c7   : > { %p1067_p1 = por %p1066_p8, %p1065_p0 }
 0x4c9   : > { %p1068_p12 = pnand %p1067_p1, %p1061_p2 }
 0x4cb   : > { %1071 = shalt.err (!%p1068_p12)
}
 0x4cc   : > { %816 = dma.vmem_to_hbm [thread:$0]  (%p1554_p6), %s1467_s16, 128, %s1465_s15, %s527_s14  }
 0x4cd PF: > { %s570_s23 = sand.u32 1, %s1114_s18   ;;  %p1555_p13 = scmp.ne.s32.totalorder %s1529_s25, 0 }
 0x4ce   : > { %p1556_p9 = scmp.ge.s32.totalorder %s1126_s21, 2  ;;  %s571_s1 = scalar_lea.sflag [#allocation4], %s570_s23 }
 0x4d0   : > { %p835_p5 = pnand %p1556_p9, %p1555_p13 }
 0x4d2   : > { %1105 = dma.done.wait (!%p835_p5), %s571_s1, 128  }
 0x4d3   : > { %1107 = vsyncadd (!%p835_p5), %s571_s1, 4294967168  ;;  %s580_s20 = scalar_lea.sflag [#allocation11], %s570_s23 }
 0x4d4   : > { %1109 = dma.done.wait (!%p835_p5), %s580_s20, 128  }
 0x4d5   : > { %1111 = vsyncadd (!%p835_p5), %s580_s20, 4294967168  ;;  %s1557_s6 = sld [smem:[#allocation18_spill]]  ;;  %s1558_s20 = sld [smem:[#allocation19_spill]] }
 0x4d6   : > { %p23_p6 = scmp.ge.s32.totalorder %s1222_s29, 4   ;;  %s1559_s18 = smov %s1118_s19 }
 0x4d7   : > { %s1561_s21 = smov %s1222_s29 }
 0x4d8   :  { %25 = sbr.rel (!%p23_p6) target bundleno = 11 (0xb), region = 117 }
 0x4db   : > { %s1560_s19 = smov %s1557_s6 }
 0x4df   :  { %585 = vsyncpa [#allocation3], 1 }
 0x4e0   :  { %587 = vsyncpa [#allocation3 + $0x1], 1 }
 0x4e1   :  { %588 = vsyncpa [#allocation6], 1 }
 0x4e2   :  { %589 = vsyncpa [#allocation4], 1 }
 0x4e3   :  { %591 = vsyncpa [#allocation4 + $0x1], 1 }
 0x4e4   :  { %592 = vsyncpa [#allocation11], 1 }
 0x4e5   :  { %594 = vsyncpa [#allocation11 + $0x1], 1 }

</bundles_post_ra>
